<compile_context>
chip_gen: v5e
topology: v5e:2x2
jax: 0.10.0
libtpu: 0.0.40
codegen_flags: <defaults>
</compile_context>

<pallas_src>
import functools

import jax
import jax.numpy as jnp
from jax import lax
from jax.experimental import pallas as pl
from jax.experimental.pallas import tpu as pltpu

KERNEL_SIZE = 3      # config.LOSS.KERNEL_SIZE (odd so avg_pool preserves H, W)
_LANES = 128         # lane width of the per-core partial-sum output row


def _shift_zero(x, d, axis):
    """Shift x by `d` along `axis`, zero-filling (static shift).

    result[..., i, ...] = x[..., i - d, ...]  if 0 <= i - d < n  else 0
    """
    if d == 0:
        return x
    axis = axis % x.ndim
    n = x.shape[axis]
    if abs(d) >= n:
        return jnp.zeros_like(x)
    pad_shape = list(x.shape)
    pad_shape[axis] = abs(d)
    z = jnp.zeros(pad_shape, x.dtype)
    idx = [slice(None)] * x.ndim
    if d > 0:
        idx[axis] = slice(0, n - d)
        return jnp.concatenate([z, x[tuple(idx)]], axis=axis)
    else:
        idx[axis] = slice(-d, n)
        return jnp.concatenate([x[tuple(idx)], z], axis=axis)


def _box_avg_2d(t, ksize):
    """Stride-1 avg pool, zero padding, count_include_pad=True — separable."""
    pad = ksize // 2
    v = t                                          # vertical K-tap sum
    for d in range(1, pad + 1):
        v = v + _shift_zero(t, d, axis=-2) + _shift_zero(t, -d, axis=-2)
    a = v                                          # horizontal K-tap sum
    for d in range(1, pad + 1):
        a = a + _shift_zero(v, d, axis=-1) + _shift_zero(v, -d, axis=-1)
    return a * (1.0 / float(ksize * ksize))


def _weighted_bce_kernel(pred_ref, target_ref, out_ref, *, ksize):
    # out_ref: (1, 128) per-core partial-sum row, resident across the inner
    # (reduction) grid axis.  lane 0: Σbce, lane 1: Σ(ind·bce), lane 2: Σind.
    @pl.when(pl.program_id(1) == 0)
    def _():
        out_ref[...] = jnp.zeros_like(out_ref)

    x = pred_ref[...].astype(jnp.float32)    # logits
    t = target_ref[...].astype(jnp.float32)  # targets

    # avg_pool2d(target, K, padding=K//2, stride=1) — per-(b,c) plane, no halo.
    a = _box_avg_2d(t, ksize)
    ind = jnp.logical_and(a >= 0.01, a <= 0.99).astype(jnp.float32)

    # Numerically stable BCE-with-logits: max(x,0) - x*t + log1p(exp(-|x|))
    bce = jnp.maximum(x, 0.0) - x * t + jnp.log1p(jnp.exp(-jnp.abs(x)))

    s_bce = jnp.sum(bce)
    s_ind_bce = jnp.sum(ind * bce)
    s_ind = jnp.sum(ind)

    lane = lax.broadcasted_iota(jnp.int32, out_ref.shape, 1)
    part = jnp.where(lane == 0, s_bce,
           jnp.where(lane == 1, s_ind_bce,
           jnp.where(lane == 2, s_ind, 0.0)))
    out_ref[...] += part


def _choose_tiling(bc, h, w, itemsize, max_tile_bytes):
    plane_bytes = max(1, h * w * itemsize)
    bc_tile = max(1, min(bc, max_tile_bytes // plane_bytes))
    while bc % bc_tile:               # keep the grid exact (no padded blocks)
        bc_tile -= 1
    nblocks = bc // bc_tile
    ncores = 2 if nblocks % 2 == 0 else 1   # v7x has 2 TCs; harmless elsewhere
    return bc_tile, nblocks // ncores, ncores


def weighted_bce(pred, target, ksize=KERNEL_SIZE, *, max_tile_bytes=1 << 20):
    assert ksize % 2 == 1, "kernel_size must be odd (weights must match target)"
    assert pred.shape == target.shape and pred.ndim == 4
    B, C, H, W = target.shape
    BC = B * C

    p3 = pred.reshape(BC, H, W)
    t3 = target.reshape(BC, H, W)

    itemsize = max(jnp.dtype(pred.dtype).itemsize,
                   jnp.dtype(target.dtype).itemsize)
    bc_tile, nsteps, ncores = _choose_tiling(BC, H, W, itemsize, max_tile_bytes)

    # 2 inputs x 2 pipeline buffers + ~f32 temporaries, clamped to [8, 32] MiB.
    in_tile = bc_tile * H * W * itemsize
    f32_tile = bc_tile * H * W * 4
    vmem_limit = int(min(max(4 * in_tile + 16 * f32_tile + (4 << 20), 8 << 20),
                         32 << 20))

    in_spec = pl.BlockSpec((bc_tile, H, W), lambda p, i: (p * nsteps + i, 0, 0))
    out = pl.pallas_call(
        functools.partial(_weighted_bce_kernel, ksize=ksize),
        grid=(ncores, nsteps),
        in_specs=[in_spec, in_spec],
        out_specs=pl.BlockSpec((1, _LANES), lambda p, i: (0, p)),
        out_shape=jax.ShapeDtypeStruct((1, ncores * _LANES), jnp.float32),
        compiler_params=pltpu.CompilerParams(
            dimension_semantics=("parallel", "arbitrary"),
            vmem_limit_bytes=vmem_limit),
    )(p3, t3)

    sums = out.reshape(ncores, _LANES).sum(axis=0)
    n = jnp.float32(BC * H * W)
    # loss = Σ(weights·bce)/N with weights = (1+2·ind)·N/(N+2·Σind)
    return (sums[0] + 2.0 * sums[1]) / (n + 2.0 * sums[2])


def weighted_bce_reference(pred, target, ksize=KERNEL_SIZE):
    """Pure-JAX reference, faithful to the PyTorch module (weights path)."""
    x = pred.astype(jnp.float32)
    t = target.astype(jnp.float32)
    pad = ksize // 2
    a = jnp.zeros_like(t)
    for dy in range(-pad, pad + 1):
        for dx in range(-pad, pad + 1):
            a = a + _shift_zero(_shift_zero(t, dy, axis=-2), dx, axis=-1)
    a = a / float(ksize * ksize)
    ind = jnp.logical_and(a >= 0.01, a <= 0.99).astype(jnp.float32)
    n = jnp.float32(t.size)
    w = 1.0 + 2.0 * ind
    w = w / jnp.sum(w) * n
    bce = jnp.maximum(x, 0.0) - x * t + jnp.log1p(jnp.exp(-jnp.abs(x)))
    return jnp.sum(w * bce) / n


if __name__ == "__main__":
    key = jax.random.PRNGKey(0)
    k1, k2 = jax.random.split(key)
    B, C, H, W = 2, 4, 16, 16

    pred = jax.random.normal(k1, (B, C, H, W), dtype=jnp.float32)        # logits
    target = (jax.random.uniform(k2, (B, C, H, W)) > 0.5).astype(jnp.float32)

    # Tiny tile budget -> bc_tile=2, grid=(2, 2): exercises the multi-step
    # accumulation + two-core partial path.
    loss_tiled = weighted_bce(pred, target, max_tile_bytes=2048)
    # Default budget -> whole tensor as one block.
    loss_whole = weighted_bce(pred, target)
    jax.block_until_ready((loss_tiled, loss_whole))

    ref = weighted_bce_reference(pred, target, KERNEL_SIZE)
    assert jnp.allclose(loss_tiled, ref, rtol=1e-4, atol=1e-5), (loss_tiled, ref)
    assert jnp.allclose(loss_whole, ref, rtol=1e-4, atol=1e-5), (loss_whole, ref)

    print("KERNEL_OK")
</pallas_src>

<mosaic_0001>
module attributes {stable_mosaic.version = 11 : i64} {
  func.func @_weighted_bce_kernel(%arg0: i32, %arg1: i32, %arg2: memref<2x16x16xf32, #tpu.memory_space<vmem>>, %arg3: memref<2x16x16xf32, #tpu.memory_space<vmem>>, %arg4: memref<1x128xf32, #tpu.memory_space<vmem>>) attributes {dimension_semantics = [#tpu.dimension_semantics<parallel>, #tpu.dimension_semantics<arbitrary>], iteration_bounds = array<i64: 2, 2>, scalar_prefetch = 0 : i64, scratch_operands = 0 : i64, tpu.core_type = #tpu.core_type<tc>, window_params = [{transform_indices = @transform_0, window_bounds = array<i64: 2, 16, 16>}, {transform_indices = @transform_1, window_bounds = array<i64: 2, 16, 16>}, {transform_indices = @transform_2, window_bounds = array<i64: 1, 128>}]} {
    %c0_i32 = arith.constant 0 : i32
    %0 = arith.cmpi eq, %arg1, %c0_i32 : i32
    %1 = arith.extui %0 : i1 to i32
    %c0_i32_0 = arith.constant 0 : i32
    %2 = arith.cmpi ne, %1, %c0_i32_0 : i32
    scf.if %2 {
      %cst_23 = arith.constant 0.000000e+00 : f32
      %70 = vector.broadcast %cst_23 : f32 to vector<1x128xf32>
      %c0_24 = arith.constant 0 : index
      %c0_25 = arith.constant 0 : index
      %71 = vector.load %arg4[%c0_24, %c0_25] : memref<1x128xf32, #tpu.memory_space<vmem>>, vector<1x128xf32>
      tpu.vector_store %arg4[%c0_24, %c0_25], %70 {strides = array<i32>} : memref<1x128xf32, #tpu.memory_space<vmem>>, vector<1x128xf32>,
    } else {
    }
    %c0 = arith.constant 0 : index
    %c0_1 = arith.constant 0 : index
    %c0_2 = arith.constant 0 : index
    %3 = vector.load %arg2[%c0, %c0_1, %c0_2] : memref<2x16x16xf32, #tpu.memory_space<vmem>>, vector<2x16x16xf32>
    %c0_3 = arith.constant 0 : index
    %c0_4 = arith.constant 0 : index
    %c0_5 = arith.constant 0 : index
    %4 = vector.load %arg3[%c0_3, %c0_4, %c0_5] : memref<2x16x16xf32, #tpu.memory_space<vmem>>, vector<2x16x16xf32>
    %cst = arith.constant 0.000000e+00 : f32
    %5 = vector.broadcast %cst : f32 to vector<2x1x16xf32>
    %6 = vector.extract_strided_slice %4 {offsets = [0, 0, 0], sizes = [2, 15, 16], strides = [1, 1, 1]} : vector<2x16x16xf32> to vector<2x15x16xf32>
    %7 = tpu.concatenate %5, %6 in 1 : vector<2x1x16xf32>, vector<2x15x16xf32> -> vector<2x16x16xf32>
    %8 = arith.addf %4, %7 : vector<2x16x16xf32>
    %cst_6 = arith.constant 0.000000e+00 : f32
    %9 = vector.broadcast %cst_6 : f32 to vector<2x1x16xf32>
    %10 = vector.extract_strided_slice %4 {offsets = [0, 1, 0], sizes = [2, 15, 16], strides = [1, 1, 1]} : vector<2x16x16xf32> to vector<2x15x16xf32>
    %11 = tpu.concatenate %10, %9 in 1 : vector<2x15x16xf32>, vector<2x1x16xf32> -> vector<2x16x16xf32>
    %12 = arith.addf %8, %11 : vector<2x16x16xf32>
    %cst_7 = arith.constant 0.000000e+00 : f32
    %13 = vector.broadcast %cst_7 : f32 to vector<2x16x1xf32>
    %14 = vector.extract_strided_slice %12 {offsets = [0, 0, 0], sizes = [2, 16, 15], strides = [1, 1, 1]} : vector<2x16x16xf32> to vector<2x16x15xf32>
    %15 = tpu.concatenate %13, %14 in 2 : vector<2x16x1xf32>, vector<2x16x15xf32> -> vector<2x16x16xf32>
    %16 = arith.addf %12, %15 : vector<2x16x16xf32>
    %cst_8 = arith.constant 0.000000e+00 : f32
    %17 = vector.broadcast %cst_8 : f32 to vector<2x16x1xf32>
    %18 = vector.extract_strided_slice %12 {offsets = [0, 0, 1], sizes = [2, 16, 15], strides = [1, 1, 1]} : vector<2x16x16xf32> to vector<2x16x15xf32>
    %19 = tpu.concatenate %18, %17 in 2 : vector<2x16x15xf32>, vector<2x16x1xf32> -> vector<2x16x16xf32>
    %20 = arith.addf %16, %19 : vector<2x16x16xf32>
    %cst_9 = arith.constant 0.111111112 : f32
    %21 = vector.broadcast %cst_9 : f32 to vector<2x16x16xf32>
    %22 = arith.mulf %20, %21 : vector<2x16x16xf32>
    %cst_10 = arith.constant 0.00999999977 : f32
    %23 = vector.broadcast %cst_10 : f32 to vector<2x16x16xf32>
    %24 = arith.cmpf oge, %22, %23 : vector<2x16x16xf32>
    %cst_11 = arith.constant 9.900000e-01 : f32
    %25 = vector.broadcast %cst_11 : f32 to vector<2x16x16xf32>
    %26 = arith.cmpf ole, %22, %25 : vector<2x16x16xf32>
    %27 = arith.andi %24, %26 : vector<2x16x16xi1>
    %28 = arith.extui %27 : vector<2x16x16xi1> to vector<2x16x16xi32>
    %29 = arith.sitofp %28 : vector<2x16x16xi32> to vector<2x16x16xf32>
    %cst_12 = arith.constant 0.000000e+00 : f32
    %30 = vector.broadcast %cst_12 : f32 to vector<2x16x16xf32>
    %31 = arith.maximumf %3, %30 : vector<2x16x16xf32>
    %32 = arith.mulf %3, %4 : vector<2x16x16xf32>
    %33 = arith.subf %31, %32 : vector<2x16x16xf32>
    %34 = math.absf %3 : vector<2x16x16xf32>
    %cst_13 = arith.constant 0.000000e+00 : f32
    %35 = vector.broadcast %cst_13 : f32 to vector<2x16x16xf32>
    %36 = arith.subf %35, %34 : vector<2x16x16xf32>
    %37 = math.exp %36 : vector<2x16x16xf32>
    %38 = math.log1p %37 : vector<2x16x16xf32>
    %39 = arith.addf %33, %38 : vector<2x16x16xf32>
    %40 = vector.shape_cast %39 : vector<2x16x16xf32> to vector<1x2x16x16xf32>
    %cst_14 = arith.constant dense<0.000000e+00> : vector<1xf32>
    %41 = vector.multi_reduction <add>, %40, %cst_14 [1, 2, 3] : vector<1x2x16x16xf32> to vector<1xf32>
    %42 = vector.shape_cast %41 : vector<1xf32> to vector<1x1x1x1xf32>
    %43 = vector.extract %42[0, 0, 0, 0] : f32 from vector<1x1x1x1xf32>
    %44 = arith.mulf %29, %39 : vector<2x16x16xf32>
    %45 = vector.shape_cast %44 : vector<2x16x16xf32> to vector<1x2x16x16xf32>
    %cst_15 = arith.constant dense<0.000000e+00> : vector<1xf32>
    %46 = vector.multi_reduction <add>, %45, %cst_15 [1, 2, 3] : vector<1x2x16x16xf32> to vector<1xf32>
    %47 = vector.shape_cast %46 : vector<1xf32> to vector<1x1x1x1xf32>
    %48 = vector.extract %47[0, 0, 0, 0] : f32 from vector<1x1x1x1xf32>
    %49 = vector.shape_cast %29 : vector<2x16x16xf32> to vector<1x2x16x16xf32>
    %cst_16 = arith.constant dense<0.000000e+00> : vector<1xf32>
    %50 = vector.multi_reduction <add>, %49, %cst_16 [1, 2, 3] : vector<1x2x16x16xf32> to vector<1xf32>
    %51 = vector.shape_cast %50 : vector<1xf32> to vector<1x1x1x1xf32>
    %52 = vector.extract %51[0, 0, 0, 0] : f32 from vector<1x1x1x1xf32>
    %53 = tpu.iota {dimensions = array<i32: 1>} : vector<1x128xi32>
    %c0_i32_17 = arith.constant 0 : i32
    %54 = vector.broadcast %c0_i32_17 : i32 to vector<1x128xi32>
    %55 = arith.cmpi eq, %53, %54 : vector<1x128xi32>
    %c1_i32 = arith.constant 1 : i32
    %56 = vector.broadcast %c1_i32 : i32 to vector<1x128xi32>
    %57 = arith.cmpi eq, %53, %56 : vector<1x128xi32>
    %c2_i32 = arith.constant 2 : i32
    %58 = vector.broadcast %c2_i32 : i32 to vector<1x128xi32>
    %59 = arith.cmpi eq, %53, %58 : vector<1x128xi32>
    %cst_18 = arith.constant 0.000000e+00 : f32
    %60 = vector.broadcast %52 : f32 to vector<1x128xf32>
    %61 = vector.broadcast %cst_18 : f32 to vector<1x128xf32>
    %62 = arith.select %59, %60, %61 : vector<1x128xi1>, vector<1x128xf32>
    %63 = vector.broadcast %48 : f32 to vector<1x128xf32>
    %64 = arith.select %57, %63, %62 : vector<1x128xi1>, vector<1x128xf32>
    %65 = vector.broadcast %43 : f32 to vector<1x128xf32>
    %66 = arith.select %55, %65, %64 : vector<1x128xi1>, vector<1x128xf32>
    %c0_19 = arith.constant 0 : index
    %c0_20 = arith.constant 0 : index
    %67 = vector.load %arg4[%c0_19, %c0_20] : memref<1x128xf32, #tpu.memory_space<vmem>>, vector<1x128xf32>
    %68 = arith.addf %67, %66 : vector<1x128xf32>
    %c0_21 = arith.constant 0 : index
    %c0_22 = arith.constant 0 : index
    %69 = vector.load %arg4[%c0_21, %c0_22] : memref<1x128xf32, #tpu.memory_space<vmem>>, vector<1x128xf32>
    tpu.vector_store %arg4[%c0_21, %c0_22], %68 {strides = array<i32>} : memref<1x128xf32, #tpu.memory_space<vmem>>, vector<1x128xf32>,
    return
  }
  func.func @transform_0(%arg0: i32, %arg1: i32) -> (i32, i32, i32) {
    %c2_i32 = arith.constant 2 : i32
    %0 = arith.muli %arg0, %c2_i32 : i32
    %1 = arith.addi %0, %arg1 : i32
    %c0_i32 = arith.constant 0 : i32
    %c0_i32_0 = arith.constant 0 : i32
    %c0_i32_1 = arith.constant 0 : i32
    return %1, %c0_i32, %c0_i32_0 : i32, i32, i32
  }
  func.func @transform_1(%arg0: i32, %arg1: i32) -> (i32, i32, i32) {
    %c2_i32 = arith.constant 2 : i32
    %0 = arith.muli %arg0, %c2_i32 : i32
    %1 = arith.addi %0, %arg1 : i32
    %c0_i32 = arith.constant 0 : i32
    %c0_i32_0 = arith.constant 0 : i32
    %c0_i32_1 = arith.constant 0 : i32
    return %1, %c0_i32, %c0_i32_0 : i32, i32, i32
  }
  func.func @transform_2(%arg0: i32, %arg1: i32) -> (i32, i32) {
    %c0_i32 = arith.constant 0 : i32
    %c0_i32_0 = arith.constant 0 : i32
    return %c0_i32, %arg0 : i32, i32
  }
}

</mosaic_0001>

<bundles_post_ra>
// kernel: tpu_custom_call.1
= control target key start
LH: loop header
LB: loop body
LE: loop exit
PB: predicated region body
PF: predicated region fallthrough
CT: control target
= control target key end

     0   :  { %s1288_s0 = inlined_call_operand.hbm [shape: f32[8,16,16], index: 0, kind: input, shape index: {}]   ;;  %s1289_s1 = inlined_call_operand.hbm [shape: f32[8,16,16], index: 1, kind: input, shape index: {}]   ;;  %s1290_s2 = inlined_call_operand.hbm [shape: f32[1,256], index: 2, kind: output, shape index: {}]  }
   0x1   :  { %1296 = sst [smem:[#allocation18_spill]] %s1288_s0 }
   0x2   :  { %7 = vsyncpa [#allocation3], 0 }
   0x3   :  { %9 = vsyncpa [#allocation3 + $0x1], 0 }
   0x4   :  { %10 = vsyncpa [#allocation6], 0 }
   0x5   :  { %12 = vsyncpa [#allocation6 + $0x1], 0 }
   0x6   :  { %13 = vsyncpa [#allocation4], 0 }
   0x7   :  { %15 = vsyncpa [#allocation4 + $0x1], 0  ;;  %s986_s9 = smov 0   ;;  %s988_s10 = smov 0  }
   0x8   :  { %s990_s11 = smov 0   ;;  %s992_s12 = smov 0  }
   0x9   :  { %s994_s13 = smov 0   ;;  %s996_s14 = smov 0  }
   0xa   :  { %s998_s15 = smov 0   ;;  %s1000_s16 = smov 0  }
   0xb   :  { %s1002_s17 = smov 0   ;;  %s1004_s18 = smov 0  }
   0xc   :  { %s1006_s19 = smov 0  }
   0xd LB: > { %1297 = sst [smem:[#allocation11_spill]] %s943_s14  ;;  %s610_s20 = sadd.s32 4294967295, %s963_s19   ;;  %s963_s19 = sphi %s1006_s19, %s21_s19   ;;  %s959_s18 = sphi %s1004_s18, %s1320_s18   ;;  %s955_s17 = sphi %s1002_s17, %s1319_s17   ;;  %s951_s16 = sphi %s1000_s16, %s1318_s16   ;;  %s947_s15 = sphi %s998_s15, %s1317_s15   ;;  %s943_s14 = sphi %s996_s14, %s1316_s14   ;;  %s939_s13 = sphi %s994_s13, %s1325_s13   ;;  %s935_s12 = sphi %s992_s12, %s1324_s12   ;;  %s931_s11 = sphi %s990_s11, %s1323_s11   ;;  %s927_s10 = sphi %s988_s10, %s1322_s10   ;;  %s923_s9 = sphi %s986_s9, %s1321_s9  }
   0xe   : > { %1298 = sst [smem:[#allocation12_spill]] %s955_s17  ;;  %s611_s21 = sadd.s32 4294967294, %s963_s19  }
   0xf   : > { %1299 = sst [smem:[#allocation13_spill]] %s959_s18  ;;  %s30_s22 = sadd.s32 1, %s955_s17 }
  0x10   : > { %s33_s23 = sadd.s32 1, %s959_s18  ;;  %p31_p0 = scmp.ge.s32.totalorder %s30_s22, 2 }
  0x11   : > { %s612_s24 = sshll.u32 %s959_s18, 1  ;;  %s44_s26 = sadd.s32 1, %s943_s14 }
  0x12   : > { %s1045_s25 = sadd.s32 %s955_s17, %s612_s24  ;;  %s1327_s22 = smov (%p31_p0, %s30_s22), 0 }
  0x13   : > { %1300 = sst [smem:[#allocation14_spill]] %s1327_s22  ;;  %s1329_s23 = smov (!%p31_p0, %s33_s23), %s959_s18 }
  0x14   : > { %p51_p1 = scmp.ne.s32.totalorder %s943_s14, %s939_s13  ;;  %p52_p2 = scmp.eq.s32.totalorder %s963_s19, 0 }
  0x15   : > { %p35_p3 = scmp.ge.s32.totalorder %s1329_s23, 2  ;;  %p57_p4 = scmp.ne.s32.totalorder %s939_s13, %s935_s12 }
  0x16   : > { %p1055_p5 = por %p52_p2, %p51_p1  ;;  %p58_p6 = scmp.eq.s32.totalorder %s610_s20, 0 }
  0x17   : > { %s1331_s23 = smov (%p35_p3, %s1329_s23), 0  ;;  %s100_s29 = sadd.s32 1, %s931_s11 }
  0x18   : > { %1302 = sst [smem:[#allocation15_spill]] %s1331_s23  ;;  %p1061_p7 = por %p58_p6, %p57_p4 }
  0x19   : > { %s613_s30 = sshll.u32 %s1331_s23, 1  ;;  %s97_s3 = ssub.s32 %s959_s18, %s1331_s23 }
  0x1a   : > { %s40_s4 = sadd.s32 %s613_s30, %s1327_s22  ;;  %p98_p8 = scmp.eq.s32.totalorder %s97_s3, 0 }
  0x1b   : > { %s41_s5 = ssub.s32 %s1045_s25, %s40_s4  ;;  %p110_p9 = scmp.ne.s32.totalorder %s931_s11, %s927_s10 }
  0x1c   : > { %p42_p10 = scmp.eq.s32.totalorder %s41_s5, 0  ;;  %p111_p11 = scmp.eq.s32.totalorder %s610_s20, 3 }
  0x1d   : > { %s1074_s6 = scalar_select %p98_p8, %s931_s11, %s100_s29  }
  0x1e   : > { %s1077_s7 = scalar_select %p42_p10, %s943_s14, %s44_s26  }
  0x1f   : > { %1304 = sst [smem:[#allocation16_spill]] %s1074_s6  ;;  %p1079_p12 = por %p111_p11, %p110_p9 }
  0x20   : > { %1305 = sst [smem:[#allocation17_spill]] %s1077_s7  ;;  %p116_p13 = scmp.ne.s32.totalorder %s927_s10, %s923_s9 }
  0x21   : > { %p117_p0 = scmp.eq.s32.totalorder %s611_s21, 3  ;;  %p665_p1 = scmp.lt.s32.totalorder %s963_s19, 4 }
  0x22   : > { %s1089_s12 = sand.u32 1, %s943_s14   ;;  %s639_s26 = sshll.u32 %s1045_s25, 5 }
  0x23   : > { %p1091_p2 = por %p117_p0, %p116_p13  ;;  %s618_s24 = sshll.u32 %s1089_s12, 5 }
  0x24   : > { %s1308_s0 = sld [smem:[#allocation18_spill]]  ;;  %s141_s5 = scalar_lea.vmem [#allocation2], %s618_s24 }
  0x25   : > { %s152_s23 = sshll.u32 %s141_s5, 4  ;;  %p1102_p3 = pnand %p665_p1, %p1055_p5  ;;  %s153_s23 = int_to_ptr.vmem [resolvable:$true] %s152_s23 }
  0x26   : > { %p628_p4 = scmp.ge.s32.totalorder %s963_s19, 1  ;;  %p185_p6 = scmp.lt.s32.totalorder %s963_s19, 5 }
  0x27   : > { %s138_s25 = scalar_lea.sflag [#allocation3], %s1089_s12  ;;  %s965_s22 = smov 128  }
  0x28   : > { %s966_s18 = smov 8   ;;  %p186_p8 = pnand %p628_p4, %p185_p6 }
  0x29   : > { %s166_s27 = scalar_lea.vmem [#allocation5], %s618_s24  ;;  %s163_s17 = scalar_lea.sflag [#allocation6], %s1089_s12 }
  0x2a   : > { %s149_s3 = scalar_lea.hbm %s1308_s0, %s639_s26  ;;  %s177_s0 = sshll.u32 %s166_s27, 4  ;;  %s178_s0 = int_to_ptr.vmem [resolvable:$true] %s177_s0 }
  0x2b   : > { %s150_s4 = sshll.u32 %s149_s3, 4  ;;  %s174_s3 = scalar_lea.hbm %s1289_s1, %s639_s26  ;;  %s151_s4 = int_to_ptr.hbm [resolvable:$true] %s150_s4 }
  0x2c   : > { %657 = dma.hbm_to_vmem [thread:$0]  (!%p1102_p3), %s151_s4, 512, %s153_s23, %s138_s25, %s965_s22, %s965_s22, %s966_s18  }
  0x2d   : > { %s175_s5 = sshll.u32 %s174_s3, 4  ;;  %189 = sbr.rel (%p186_p8) target bundleno = 404 (0x194), region = 28  ;;  %s176_s5 = int_to_ptr.hbm [resolvable:$true] %s175_s5 }
  0x2e   : > { %660 = dma.hbm_to_vmem [thread:$0]  (!%p1102_p3), %s176_s5, 512, %s178_s0, %s163_s17, %s965_s22, %s965_s22, %s966_s18  }
  0x2f   : > { %s191_s7 = sand.u32 (!%p186_p8), 1, %s939_s13  }
  0x30   : > { %s629_s14 = sshll.u32 (!%p186_p8), %s191_s7, 5  ;;  %s192_s6 = scalar_lea.sflag (!%p186_p8), [#allocation3], %s191_s7 }
  0x31   : > { %s1118_s23 = scalar_lea.vmem (!%p186_p8), [#allocation2], %s629_s14 }
  0x32   : > { %910 = dma.done.wait (%p1061_p7), %s192_s6, 512  }
  0x33   : > { %912 = vsyncadd (%p1061_p7), %s192_s6, 4294966784  ;;  %s202_s24 = scalar_lea.sflag [#allocation6], %s191_s7  ;;  %s205_s26 = scalar_lea.vmem [#allocation5], %s629_s14 }
  0x34   : > { %914 = dma.done.wait (%p1061_p7), %s202_s24, 512  }
  0x35   : > { %916 = vsyncadd (%p1061_p7), %s202_s24, 4294966784  ;;  %s229_s0 = sand.u32 1, %s927_s10   ;;  %p631_p5 = scmp.ne.s32.totalorder %s947_s15, 0 }
  0x36   : > { %s1131_s17 = scalar_lea.vmem [#allocation7], %s229_s0 }
  0x37   : > { %240 = sbr.rel (%p631_p5) target bundleno = 62 (0x3e), region = 40 }
  0x3c   : > { %v967_v0 = vmov 0.0  }
  0x3d   : > { %241 = vst [vmem:[%s1131_s17] sm:$0x1] %v967_v0 }
  0x3e PF: > { %v1135_v1 = vld [vmem:[%s205_s26 + $0x10] sm:$0xff]  ;;  %v1137_v2 = vld [vmem:[%s205_s26 + $0x18] sm:$0xff]  ;;  %vm254_vm0 = vcmask 1040384   ;;  %vm271_vm1 = vcmask 1046528   ;;  %v1139_v3 = vld [vmem:[%s205_s26] sm:$0xff]  ;;  %s968_s14 = smov 1   ;;  %s502_s7 = scalar_lea.hbm %s1290_s2, %s951_s16 }
  0x3f   : > { %v258_v4 = vrot.slane %v1135_v1, 7  ;;  %v275_v5 = vrot.slane %v1135_v1, 1  ;;  %v276_v6 = vrot.slane %v1137_v2, 1  ;;  %v1144_v7 = vld [vmem:[%s205_s26 + $0x8] sm:$0xff]  ;;  %v255_v8 = vrot.slane %v1139_v3, 7  ;;  %s969_s15 = smov 127  }
  0x40   : > { %v272_v9 = vrot.slane %v1139_v3, 1  ;;  %v273_v10 = vrot.slane %v1144_v7, 1  ;;  %v256_v11 = vrot.slane %v1144_v7, 7  ;;  %v259_v15 = vrot.slane %v1137_v2, 7  ;;  %v242_v29 = vld [vmem:[%s1118_s23] sm:$0xff]  ;;  %v243_v31 = vld [vmem:[%s1118_s23 + $0x8] sm:$0xff] }
  0x41   : > { %v266_v12 = vsel %vm254_vm0, 0.0, %v258_v4  ;;  %v277_v13 = vsel %vm271_vm1, %v275_v5, %v276_v6  ;;  %v265_v14 = vsel %vm254_vm0, 0.0, %v255_v8  ;;  %v283_v27 = vsel %vm271_vm1, %v276_v6, 0.0  ;;  %v244_v34 = vld [vmem:[%s1118_s23 + $0x10] sm:$0xff]  ;;  %v1183_v38 = vld [vmem:[%s1118_s23 + $0x18] sm:$0xff]  ;;  %s504_s4 = sshll.u32 %s1131_s17, 4  ;;  %s505_s4 = int_to_ptr.vmem [resolvable:$true] %s504_s4 }
  0x42   : > { %v269_v16 = vadd.f32 %v266_v12, %v1135_v1  ;;  %v267_v17 = vadd.f32 %v265_v14, %v1139_v3  ;;  %v274_v18 = vsel %vm271_vm1, %v272_v9, %v273_v10  ;;  %v257_v19 = vsel %vm254_vm0, %v255_v8, %v256_v11  ;;  %s506_s21 = sshll.u32 %s502_s7, 4  ;;  %s494_s16 = scalar_lea.sflag [#allocation4], %s229_s0  ;;  %s507_s21 = int_to_ptr.hbm [resolvable:$true] %s506_s21 }
  0x43   : > { %v268_v20 = vadd.f32 %v257_v19, %v1144_v7  ;;  %v282_v21 = vsel %vm271_vm1, %v273_v10, 0.0  ;;  %v260_v25 = vsel %vm254_vm0, %v258_v4, %v259_v15  ;;  %v370_v30 = vand.u32 2147483647, %v242_v29  ;;  %s851_s25 = sshra.s32 %s507_s21, 4  ;;  %s857_s5 = scalar_lea.hbm %s1290_s2, 2  ;;  %s852_s25 = int_to_ptr.hbm [resolvable:$true] %s851_s25 }
  0x44   : > { %v1160_v22 = vadd.f32 %v277_v13, %v269_v16  ;;  %v1162_v23 = vadd.f32 %v274_v18, %v267_v17  ;;  %v270_v26 = vadd.f32 %v260_v25, %v1137_v2  ;;  %v371_v33 = vand.u32 2147483647, %v243_v31  ;;  %s853_s29 = scalar_lea.hbm %s852_s25, 1  ;;  %p858_p11 = scmp.lt.s32.totalorder %s852_s25, %s1290_s2 }
  0x45   : > { %v1164_v24 = vadd.f32 %v282_v21, %v268_v20  ;;  %v374_v32 = vsub.f32 0.0, %v370_v30  ;;  %v372_v36 = vand.u32 2147483647, %v244_v34  ;;  %v373_v39 = vand.u32 2147483647, %v1183_v38  ;;  %p854_p7 = scmp.ne.s32.totalorder %s852_s25, %s853_s29  ;;  %p859_p13 = scmp.lt.s32.totalorder %s857_s5, %s853_s29 }
  0x46   : > { %296 = vrot.lane.b32.xlu1 %v1160_v22, %s968_s14  ;;  %292 = vrot.lane.b32.xlu0 %v1162_v23, %s968_s14  ;;  %v1172_v28 = vadd.f32 %v283_v27, %v270_v26  ;;  %v375_v37 = vsub.f32 0.0, %v371_v33  ;;  %v358_v57 = vmax.f32 %v242_v29, 0.0  ;;  %v362_v58 = vmul.f32 %v1139_v3, %v242_v29 }
  0x47   : > { %315 = vrot.lane.b32.xlu2 %v1164_v24, %s969_s15  ;;  %v378_v35 = vmul.f32 1.442695, %v374_v32  ;;  %v376_v40 = vsub.f32 0.0, %v372_v36  ;;  %v377_v42 = vsub.f32 0.0, %v373_v39  ;;  %v359_v5 = vmax.f32 %v243_v31, 0.0  ;;  %p855_p9 = pnand %p854_p7, %p1079_p12  ;;  %p860_p0 = por %p859_p13, %p858_p11 }
  0x48   : > { %v380_v41 = vmul.f32 1.442695, %v375_v37  ;;  %v363_v6 = vmul.f32 %v1144_v7, %v243_v31  ;;  %v366_v12 = vsub.f32 %v358_v57, %v362_v58  ;;  %v360_v13 = vmax.f32 %v244_v34, 0.0 }
  0x49   : > { %761 = vpow2.f32 %v378_v35  ;;  %v382_v43 = vmul.f32 1.442695, %v376_v40  ;;  %v384_v44 = vmul.f32 1.442695, %v377_v42  ;;  %v364_v14 = vmul.f32 %v1135_v1, %v244_v34  ;;  %p856_p10 = pneg %p855_p9 }
  0x4a   : > { %763 = vpow2.f32 %v380_v41  ;;  %v367_v15 = vsub.f32 %v359_v5, %v363_v6  ;;  %v361_v7 = vmax.f32 %v1183_v38, 0.0  ;;  %v365_v20 = vmul.f32 %v1137_v2, %v1183_v38 }
  0x4b   : > { %765 = vpow2.f32 %v382_v43  ;;  %v368_v26 = vsub.f32 %v360_v13, %v364_v14  ;;  %vm426_vm5 = vcmask 130048   ;;  %vm304_vm7 = vcmask 7168   ;;  %p861_p1 = pnand %p860_p0, %p856_p10 }
  0x4c   : > { %767 = vpow2.f32 %v384_v44  ;;  %v369_v33 = vsub.f32 %v361_v7, %v365_v20  ;;  %vm325_vm8 = vcmask 121856  }
  0x4e   : > { %313 = vrot.lane.b32.xlu1 %v1162_v23, %s969_s15  ;;  %294 = vrot.lane.b32.xlu0 %v1164_v24, %s968_s14 }
  0x4f   : > { %298 = vrot.lane.b32.xlu2 %v1172_v28, %s968_s14  ;;  %v762_v45 = vpop.eup %761 }
  0x50   : > { %v386_v46 = vadd.f32 1.0, %v762_v45  ;;  %v764_v47 = vpop.eup %763  ;;  %v389_v52 = vmul.f32 -0.5, %v762_v45  ;;  %v392_v59 = vand.u32 2147483647, %v762_v45 }
  0x51   : > { %v395_v48 = vadd.f32 1.0, %v764_v47  ;;  %v766_v49 = vpop.eup %765  ;;  %v398_v55 = vmul.f32 -0.5, %v764_v47  ;;  %v401_v10 = vand.u32 2147483647, %v764_v47 }
  0x52   : > { %769 = vlog2.f32 %v386_v46  ;;  %v404_v50 = vadd.f32 1.0, %v766_v49  ;;  %v768_v51 = vpop.eup %767  ;;  %v390_v54 = vadd.f32 1.0, %v389_v52  ;;  %v407_v63 = vmul.f32 -0.5, %v766_v49 }
  0x53   : > { %771 = vlog2.f32 %v395_v48  ;;  %v413_v53 = vadd.f32 1.0, %v768_v51  ;;  %v399_v62 = vadd.f32 1.0, %v398_v55  ;;  %vm1187_vm2 = vcmp.lt.f32.partialorder %v392_v59, 0.0004427343 }
  0x54   : > { %773 = vlog2.f32 %v404_v50  ;;  %v391_v61 = vmul.f32 %v762_v45, %v390_v54  ;;  %vm1195_vm3 = vcmp.lt.f32.partialorder %v401_v10, 0.0004427343  ;;  %v408_v17 = vadd.f32 1.0, %v407_v63 }
  0x55   : > { %775 = vlog2.f32 %v413_v53  ;;  %v400_v9 = vmul.f32 %v764_v47, %v399_v62  ;;  %v416_v18 = vmul.f32 -0.5, %v768_v51  ;;  %v410_v1 = vand.u32 2147483647, %v766_v49 }
  0x56   : > { %317 = vrot.lane.b32.xlu0 %v1160_v22, %s969_s15  ;;  %319 = vrot.lane.b32.xlu1 %v1172_v28, %s969_s15  ;;  %v409_v27 = vmul.f32 %v766_v49, %v408_v17  ;;  %v419_v32 = vand.u32 2147483647, %v768_v51 }
  0x57   : > { %v417_v31 = vadd.f32 1.0, %v416_v18  ;;  %vm411_vm4 = vcmp.lt.f32.partialorder %v410_v1, 0.0004427343 }
  0x58   : > { %v770_v56 = vpop.eup %769  ;;  %vm420_vm6 = vcmp.lt.f32.partialorder %v419_v32, 0.0004427343 }
  0x59   : > { %v388_v60 = vmul.f32 0.6931472, %v770_v56  ;;  %v772_v0 = vpop.eup %771  ;;  %v418_v36 = vmul.f32 %v768_v51, %v417_v31 }
  0x5a   : > { %v397_v8 = vmul.f32 0.6931472, %v772_v0  ;;  %v774_v11 = vpop.eup %773 }
  0x5b   : > { %v394_v3 = vsel %vm1187_vm2, %v391_v61, %v388_v60  ;;  %v776_v19 = vpop.eup %775  ;;  %v406_v25 = vmul.f32 0.6931472, %v774_v11 }
  0x5c   : > { %v403_v21 = vsel %vm1195_vm3, %v400_v9, %v397_v8  ;;  %v422_v29 = vadd.f32 %v394_v3, %v366_v12  ;;  %v415_v30 = vmul.f32 0.6931472, %v776_v19  ;;  %v970_v8 = vmov 0.0  }
  0x5d   : > { %v423_v34 = vadd.f32 %v403_v21, %v367_v15  ;;  %v412_v35 = vsel %vm411_vm4, %v409_v27, %v406_v25 }
  0x5e   : > { %v427_v2 = vsel %vm426_vm5, %v422_v29, 0.0  ;;  %v1205_v37 = vadd.f32 %v412_v35, %v368_v26  ;;  %v421_v39 = vsel %vm420_vm6, %v418_v36, %v415_v30 }
  0x5f   : > { %v428_v38 = vsel %vm426_vm5, %v423_v34, 0.0  ;;  %v1208_v41 = vadd.f32 %v421_v39, %v369_v33 }
  0x60   : > { %v429_v40 = vadd.f32 %v428_v38, %v427_v2  ;;  %v430_v42 = vsel %vm426_vm5, %v1205_v37, 0.0 }
  0x61   : > { %v432_v44 = vsel %vm426_vm5, %v1208_v41, 0.0 }
  0x62   : > { %v431_v43 = vadd.f32 %v430_v42, %v429_v40 }
  0x64   : > { %v433_v45 = vadd.f32 %v432_v44, %v431_v43 }
  0x78   : > { %434 = vadd.xlane.f32.xlu2 %v433_v45 }
  0xa1   : > { %v316_v46 = vpop.permute.xlu2 %315 }
  0xa2   : > { %v327_v58 = vsel %vm325_vm8, %v316_v46, 0.0 }
  0xa9   : > { %v299_v50 = vpop.permute.xlu2 %298 }
  0xaa   : > { %v308_v59 = vsel %vm304_vm7, 0.0, %v299_v50 }
  0xab   : > { %v312_v0 = vadd.f32 %v308_v59, %v1172_v28  ;;  %v490_v59 = vld [vmem:[%s1131_s17] sm:$0x1] }
  0xb8   : > { %v297_v47 = vpop.permute.xlu1 %296  ;;  %v293_v48 = vpop.permute.xlu0 %292 }
  0xb9   : > { %v305_v49 = vsel %vm304_vm7, 0.0, %v293_v48  ;;  %v307_v62 = vsel %vm304_vm7, 0.0, %v297_v47 }
  0xba   : > { %v309_v51 = vadd.f32 %v305_v49, %v1162_v23  ;;  %v311_v23 = vadd.f32 %v307_v62, %v1160_v22 }
  0xc0   : > { %v314_v52 = vpop.permute.xlu1 %313  ;;  %v295_v53 = vpop.permute.xlu0 %294 }
  0xc1   : > { %v326_v54 = vsel %vm325_vm8, %v314_v52, 0.0  ;;  %v306_v55 = vsel %vm304_vm7, 0.0, %v295_v53 }
  0xc2   : > { %v330_v56 = vadd.f32 %v326_v54, %v309_v51  ;;  %v310_v57 = vadd.f32 %v306_v55, %v1164_v24  ;;  %v479_v54 = vlaneseq }
  0xc4   : > { %v334_v60 = vmul.f32 0.11111111, %v330_v56  ;;  %v331_v61 = vadd.f32 %v327_v58, %v310_v57  ;;  %v480_v55 = vand.u32 127, %v479_v54 }
  0xc6   : > { %vm338_vm9 = vcmp.ge.f32.partialorder %v334_v60, 0.01  ;;  %vm342_vm10 = vcmp.le.f32.partialorder %v334_v60, 0.99  ;;  %v335_v63 = vmul.f32 0.11111111, %v331_v61 }
  0xc7   : > { %vm346_vm11 = vmand %vm338_vm9, %vm342_vm10  ;;  %vm482_vm6 = vcmp.eq.s32.totalorder %v480_v55, 1  ;;  %vm481_vm7 = vcmp.eq.s32.totalorder %v480_v55, 0 }
  0xc8   : > { %vm339_vm12 = vcmp.ge.f32.partialorder %v335_v63, 0.01  ;;  %vm343_vm13 = vcmp.le.f32.partialorder %v335_v63, 0.99  ;;  %v318_v4 = vpop.permute.xlu0 %317  ;;  %v320_v5 = vpop.permute.xlu1 %319  ;;  %v632_v9 = vsel %vm346_vm11, 1.0, %v970_v8 }
  0xc9   : > { %vm347_vm14 = vmand %vm339_vm12, %vm343_vm13  ;;  %v328_v24 = vsel %vm325_vm8, %v318_v4, 0.0  ;;  %v329_v6 = vsel %vm325_vm8, %v320_v5, 0.0  ;;  %v443_v14 = vmul.f32 %v632_v9, %v422_v29  ;;  %v463_v15 = vsel %vm426_vm5, %v632_v9, 0.0 }
  0xca   : > { %v332_v10 = vadd.f32 %v328_v24, %v311_v23  ;;  %v333_v11 = vadd.f32 %v329_v6, %v312_v0  ;;  %v633_v12 = vsel %vm347_vm14, 1.0, %v970_v8 }
  0xcb   : > { %v444_v3 = vmul.f32 %v633_v12, %v423_v34  ;;  %v464_v22 = vsel %vm426_vm5, %v633_v12, 0.0  ;;  %v447_v21 = vsel %vm426_vm5, %v443_v14, 0.0 }
  0xcc   : > { %v336_v13 = vmul.f32 0.11111111, %v332_v10  ;;  %v337_v28 = vmul.f32 0.11111111, %v333_v11  ;;  %v465_v18 = vadd.f32 %v464_v22, %v463_v15 }
  0xcd   : > { %v448_v16 = vsel %vm426_vm5, %v444_v3, 0.0 }
  0xce   : > { %vm340_vm15 = vcmp.ge.f32.partialorder %v336_v13, 0.01  ;;  %vm344_vm0 = vcmp.le.f32.partialorder %v336_v13, 0.99  ;;  %vm341_vm1 = vcmp.ge.f32.partialorder %v337_v28, 0.01  ;;  %v449_v1 = vadd.f32 %v448_v16, %v447_v21 }
  0xcf   : > { %vm348_vm2 = vmand %vm340_vm15, %vm344_vm0  ;;  %vm345_vm3 = vcmp.le.f32.partialorder %v337_v28, 0.99 }
  0xd0   : > { %vm349_vm4 = vmand %vm341_vm1, %vm345_vm3  ;;  %v634_v17 = vsel %vm348_vm2, 1.0, %v970_v8 }
  0xd1   : > { %v635_v19 = vsel %vm349_vm4, 1.0, %v970_v8  ;;  %v466_v7 = vsel %vm426_vm5, %v634_v17, 0.0  ;;  %v445_v20 = vmul.f32 %v634_v17, %v1205_v37 }
  0xd2   : > { %v467_v25 = vadd.f32 %v466_v7, %v465_v18  ;;  %v468_v26 = vsel %vm426_vm5, %v635_v19, 0.0  ;;  %v446_v27 = vmul.f32 %v635_v19, %v1208_v41 }
  0xd3   : > { %v450_v29 = vsel %vm426_vm5, %v445_v20, 0.0 }
  0xd4   : > { %v469_v30 = vadd.f32 %v468_v26, %v467_v25  ;;  %v451_v31 = vadd.f32 %v450_v29, %v449_v1  ;;  %v452_v32 = vsel %vm426_vm5, %v446_v27, 0.0  ;;  %vm483_vm5 = vcmp.eq.s32.totalorder %v480_v55, 2 }
  0xd6   : > { %470 = vadd.xlane.f32.xlu1 %v469_v30  ;;  %v453_v33 = vadd.f32 %v452_v32, %v451_v31 }
  0xd8   : > { %454 = vadd.xlane.f32.xlu0 %v453_v33 }
  0xeb   : > { %v435_v34 = vpop.xlane.xlu2 %434 }
  0xec   : > { %v436_v35 = vrot.slane %v435_v34, 4 }
  0xee   : > { %v437_v36 = vadd.f32 %v436_v35, %v435_v34 }
  0xf0   : > { %v438_v2 = vrot.slane %v437_v36, 2 }
  0xf2   : > { %v439_v37 = vadd.f32 %v438_v2, %v437_v36 }
  0xf4   : > { %v440_v38 = vrot.slane %v439_v37, 1 }
  0xf6   : > { %v441_v39 = vadd.f32 %v440_v38, %v439_v37 }
  0xf8   : > { %642 = vpush %v441_v39 }
 0x129   : > { %s643_s18 = spop %642 }
 0x12a   : > { %v488_v60 = vstv %s643_s18 }
 0x149   : > { %v471_v40 = vpop.xlane.xlu1 %470 }
 0x14a   : > { %v472_v41 = vrot.slane %v471_v40, 4 }
 0x14b   : > { %v455_v42 = vpop.xlane.xlu0 %454 }
 0x14c   : > { %v473_v43 = vadd.f32 %v472_v41, %v471_v40  ;;  %v456_v44 = vrot.slane %v455_v42, 4 }
 0x14e   : > { %v474_v45 = vrot.slane %v473_v43, 2  ;;  %v457_v46 = vadd.f32 %v456_v44, %v455_v42 }
 0x150   : > { %v475_v47 = vadd.f32 %v474_v45, %v473_v43  ;;  %v458_v48 = vrot.slane %v457_v46, 2 }
 0x152   : > { %v459_v49 = vadd.f32 %v458_v48, %v457_v46  ;;  %v476_v50 = vrot.slane %v475_v47, 1 }
 0x154   : > { %v460_v51 = vrot.slane %v459_v49, 1  ;;  %v477_v53 = vadd.f32 %v476_v50, %v475_v47 }
 0x156   : > { %v461_v52 = vadd.f32 %v460_v51, %v459_v49 }
 0x158   : > { %644 = vpush %v461_v52 }
 0x159   : > { %646 = vpush %v477_v53 }
 0x189   : > { %s645_s22 = spop %644 }
 0x18a   : > { %v486_v56 = vstv %s645_s22  ;;  %s647_s12 = spop %646 }
 0x18b   : > { %v484_v57 = vstv %s647_s12 }
 0x18c   : > { %v485_v58 = vsel %vm483_vm5, %v484_v57, 0.0 }
 0x18d   : > { %v487_v61 = vsel %vm482_vm6, %v486_v56, %v485_v58 }
 0x18e   : > { %v489_v62 = vsel %vm481_vm7, %v488_v60, %v487_v61 }
 0x18f   : > { %v491_v63 = vadd.f32 %v490_v59, %v489_v62 }
 0x191   : > { %492 = vst [vmem:[%s1131_s17] sm:$0x1] %v491_v63 }
 0x192   : > { %864 = shalt.err (!%p861_p1)
}
 0x193   : > { %652 = dma.vmem_to_hbm [thread:$0]  (%p1079_p12), %s505_s4, 16, %s507_s21, %s494_s16  }
 0x194 PF: > { %p666_p3 = scmp.ge.s32.totalorder %s963_s19, 2  ;;  %s518_s24 = sand.u32 1, %s923_s9  }
 0x195   : > { %s519_s26 = scalar_lea.sflag [#allocation4], %s518_s24 }
 0x196   : > { %p662_p4 = pnand %p666_p3, %p1091_p2 }
 0x198   : > { %p663_p6 = pneg %p662_p4 }
 0x19a   : > { %918 = dma.done.wait (%p663_p6), %s519_s26, 16  }
 0x19b   : > { %920 = vsyncadd (%p663_p6), %s519_s26, 4294967280  ;;  %s21_s19 = sadd.s32 1, %s963_s19   ;;  %s1314_s0 = sld [smem:[#allocation16_spill]] }
 0x19c   : > { %p18_p8 = scmp.ge.s32.totalorder %s21_s19, 6   ;;  %s1315_s8 = sld [smem:[#allocation11_spill]] }
 0x19d   : > { %s1316_s14 = sld [smem:[#allocation17_spill]]  ;;  %s1321_s9 = smov %s927_s10 }
 0x19e   : > { %s1317_s15 = sld [smem:[#allocation12_spill]]  ;;  %s1322_s10 = smov %s931_s11 }
 0x19f   : > { %s1318_s16 = sld [smem:[#allocation13_spill]]  ;;  %s1324_s12 = smov %s939_s13 }
 0x1a0   : > { %s1319_s17 = sld [smem:[#allocation14_spill]]  ;;  %20 = sbr.rel (!%p18_p8) target bundleno = 13 (0xd), region = 90 }
 0x1a1   : > { %s1320_s18 = sld [smem:[#allocation15_spill]]  ;;  %s1323_s11 = smov %s1314_s0 }
 0x1a2   : > { %s1325_s13 = smov %s1315_s8 }
 0x1a5   :  { %524 = vsyncpa [#allocation3], 1 }
 0x1a6   :  { %526 = vsyncpa [#allocation3 + $0x1], 1 }
 0x1a7   :  { %527 = vsyncpa [#allocation6], 1 }
 0x1a8   :  { %529 = vsyncpa [#allocation6 + $0x1], 1 }
 0x1a9   :  { %530 = vsyncpa [#allocation4], 1 }
 0x1aa   :  { %532 = vsyncpa [#allocation4 + $0x1], 1 }

</bundles_post_ra>
